<compile_context>
chip_gen: v7x
topology: tpu7x:2x2x1
jax: 0.10.0
libtpu: 0.0.40
codegen_flags: <defaults>
</compile_context>

<pallas_src>
import functools
import math

import jax
import jax.numpy as jnp
from jax.experimental import pallas as pl
from jax.experimental.pallas import tpu as pltpu


# --------------------------------------------------------------------------- #
# Kernel
# --------------------------------------------------------------------------- #
def _iou_sums_kernel(t_ref, x_ref, inter_ref, union_ref, *,
                     threshold, valid_cols, tiles_per_split):
    """One grid step: threshold a (rows, tile_n) tile, accumulate per-row sums."""
    c = pl.program_id(0)   # split (TensorCore shard on v7x)
    j = pl.program_id(1)   # reduction over column tiles

    @pl.when(j == 0)
    def _init():
        inter_ref[...] = jnp.zeros_like(inter_ref)
        union_ref[...] = jnp.zeros_like(union_ref)

    rows, tile_n = t_ref.shape
    col0 = (c * tiles_per_split + j) * tile_n

    def _accumulate(valid):
        tb = t_ref[...] > threshold
        xb = x_ref[...] > threshold
        inter_b = tb & xb
        union_b = tb | xb
        if valid is not None:
            inter_b = inter_b & valid
            union_b = union_b & valid
        inter_ref[...] += jnp.sum(inter_b.astype(jnp.float32), axis=1, keepdims=True)
        union_ref[...] += jnp.sum(union_b.astype(jnp.float32), axis=1, keepdims=True)

    # Fast path: fully in-range interior tile -> no iota, no mask ANDs.
    @pl.when(col0 + tile_n <= valid_cols)
    def _full_tile():
        _accumulate(None)

    # Partial tail tile: mask lanes past the true column count. Works for
    # negative thresholds too (unlike zero-padding).
    @pl.when(jnp.logical_and(col0 < valid_cols, col0 + tile_n > valid_cols))
    def _partial_tile():
        lane = jax.lax.broadcasted_iota(jnp.int32, (rows, tile_n), 1)
        _accumulate((col0 + lane) < valid_cols)

    # Fully out-of-range clamped tiles (last split when n_tiles is odd):
    # contribute nothing and skip all VPU work.


# --------------------------------------------------------------------------- #
# pallas_call wrapper
# --------------------------------------------------------------------------- #
def _iou_partial_sums(t2, x2, threshold, tile_n, num_splits, vmem_limit_bytes):
    """t2 / x2: (rows, M) arrays in native dtype. Returns two (num_splits, rows, 1)
    float32 partial-sum arrays (intersection, union)."""
    rows, M = t2.shape
    n_tiles = pl.cdiv(M, tile_n)
    tiles_per_split = pl.cdiv(n_tiles, num_splits)

    def in_index(c, j):
        # Clamp so the last split's extra iterations stay in bounds; the kernel
        # skips their contribution entirely (pl.when on col0 < valid_cols).
        return (0, jnp.minimum(c * tiles_per_split + j, n_tiles - 1))

    out_spec = pl.BlockSpec((None, rows, 1), lambda c, j: (c, 0, 0))

    kernel = functools.partial(
        _iou_sums_kernel,
        threshold=threshold,
        valid_cols=M,
        tiles_per_split=tiles_per_split,
    )

    return pl.pallas_call(
        kernel,
        out_shape=(
            jax.ShapeDtypeStruct((num_splits, rows, 1), jnp.float32),
            jax.ShapeDtypeStruct((num_splits, rows, 1), jnp.float32),
        ),
        grid_spec=pltpu.PrefetchScalarGridSpec(
            num_scalar_prefetch=0,
            grid=(num_splits, tiles_per_split),
            in_specs=[
                pl.BlockSpec((rows, tile_n), in_index),
                pl.BlockSpec((rows, tile_n), in_index),
            ],
            out_specs=(out_spec, out_spec),
        ),
        compiler_params=pltpu.CompilerParams(
            dimension_semantics=("parallel", "arbitrary"),
            vmem_limit_bytes=vmem_limit_bytes,
        ),
    )(t2, x2)


# --------------------------------------------------------------------------- #
# Hardware detection helpers (defensive; never raise)
# --------------------------------------------------------------------------- #
def _tpu_vmem_capacity_bytes():
    try:
        info = pltpu.get_tpu_info()
        cap = getattr(info, "vmem_capacity_bytes", None)
        if cap:
            return int(cap)
    except Exception:
        pass
    return 64 * 1024 * 1024  # conservative (v7x per-TC)


def _tensorcores_per_device():
    try:
        info = pltpu.get_tpu_info()
        for attr in ("num_cores", "core_count", "tensorcore_count", "num_tensorcores"):
            v = getattr(info, attr, None)
            if isinstance(v, int) and v >= 1:
                return v
    except Exception:
        pass
    try:
        kind = jax.devices()[0].device_kind.lower()
        if "7" in kind:      # v7x: 2 TensorCores per Pallas device
            return 2
    except Exception:
        pass
    return 1                  # v5e / v6e: 1 TensorCore


def _pick_packing(B, N, dtypes):
    """Sublane packing factor R: fold R chunks of each sample into separate rows
    so (rows, tile) blocks fill every vreg sublane (16 rows for bf16, 8 for f32)."""
    sublane_target = 8
    for dt in dtypes:
        itemsize = jnp.dtype(dt).itemsize
        sublane_target = max(sublane_target, 8 * max(1, 4 // itemsize))
    for want in (sublane_target, 8):
        r = want // math.gcd(B, want)
        if N % r == 0:
            return r
    return 1


# --------------------------------------------------------------------------- #
# Forward (mirrors IoU.forward)
# --------------------------------------------------------------------------- #
def iou_forward(target, inputs, threshold=0.5, *, tile_n=None, num_splits=None):
    """Returns (batch_iou, samples_inter_pixel_num, samples_union_pixel_num)."""
    # TODO(synk): the cv2.resize fallback for mismatched spatial shapes has no
    # clean Pallas equivalent (host-side bilinear resize); require equal shapes.
    assert inputs.shape[2] == target.shape[2] and inputs.shape[3] == target.shape[3]

    eps = 1e-10
    B, C, H, W = target.shape
    N = C * H * W

    R = _pick_packing(B, N, (target.dtype, inputs.dtype))
    rows = B * R
    M = N // R

    t2 = jnp.reshape(target, (rows, M))   # free row-major reshape
    x2 = jnp.reshape(inputs, (rows, M))

    # Generation-aware VMEM budgeting: big tiles on 128-MiB chips (v5e/v6e),
    # 12 MiB / 32 MiB on v7x (64 MiB VMEM per TC).
    vmem_cap = _tpu_vmem_capacity_bytes()
    if vmem_cap >= 128 * 1024 * 1024:
        budget_bytes, vmem_limit = 32 * 1024 * 1024, 64 * 1024 * 1024
    else:
        budget_bytes, vmem_limit = 12 * 1024 * 1024, 32 * 1024 * 1024

    if tile_n is None:
        bytes_per_col = rows * (jnp.dtype(target.dtype).itemsize
                                + jnp.dtype(inputs.dtype).itemsize)
        # 2 inputs x 2 double-buffers x rows*tile_n*itemsize <= budget.
        max_tile = max(128, (budget_bytes // (2 * bytes_per_col)) // 128 * 128)
        if M % 128 == 0:
            tile_n = min(max_tile, M)
        elif M <= max_tile:
            tile_n = M           # single block == full dim (compiler lane-pads)
        else:
            tile_n = max_tile    # partial last block, masked in-kernel

    n_tiles = pl.cdiv(M, tile_n)
    if num_splits is None:
        # Only split when there is a second TensorCore to feed (v7x).
        num_splits = max(1, min(_tensorcores_per_device(), n_tiles))

    inter_p, union_p = _iou_partial_sums(t2, x2, threshold, tile_n,
                                         num_splits, vmem_limit)

    # Combine split partials / packed rows in int32: per-row kernel sums are
    # exact integers (bounded by M); int32 keeps per-sample counts exact for
    # N up to 2^31 instead of f32's 2^24.
    inter_rows = jnp.sum(inter_p.astype(jnp.int32), axis=(0, 2))        # (rows,)
    union_rows = jnp.sum(union_p.astype(jnp.int32), axis=(0, 2))
    inter_per_sample = jnp.sum(inter_rows.reshape(B, R), axis=1)        # (B,)
    union_per_sample = jnp.sum(union_rows.reshape(B, R), axis=1)

    total_inter = jnp.sum(inter_per_sample).astype(jnp.float32)
    total_union = jnp.sum(union_per_sample).astype(jnp.float32)
    mean_inter = total_inter / jnp.float32(B * N)
    # mean(inter)/mean(union) == sum(inter)/sum(union) (same element count).
    batch_iou = jnp.where(mean_inter < eps, jnp.float32(0.0),
                          total_inter / total_union)

    return (batch_iou,
            inter_per_sample.astype(jnp.float32),
            union_per_sample.astype(jnp.float32))


# --------------------------------------------------------------------------- #
# Reference + tests
# --------------------------------------------------------------------------- #
def _reference(target, inputs, threshold=0.5):
    t_ = (target > threshold).astype(jnp.float32)
    x_ = (inputs > threshold).astype(jnp.float32)
    inter = jnp.clip(x_ * t_, 0.0, 1.0)
    union = jnp.clip(x_ + t_, 0.0, 1.0)
    iou = jnp.where(jnp.mean(inter) < 1e-10, jnp.float32(0.0),
                    jnp.mean(inter) / jnp.mean(union))
    return iou, jnp.sum(inter, axis=(1, 2, 3)), jnp.sum(union, axis=(1, 2, 3))


if __name__ == "__main__":
    key = jax.random.PRNGKey(0)

    # Primary small-shape test (B, C, H, W) = (2, 4, 16, 16), float32.
    k1, k2 = jax.random.split(key)
    B, C, H, W = 2, 4, 16, 16
    target = jax.random.uniform(k1, (B, C, H, W), dtype=jnp.float32)
    inputs = jax.random.uniform(k2, (B, C, H, W), dtype=jnp.float32)

    out = iou_forward(target, inputs, threshold=0.5)
    jax.block_until_ready(out)
    batch_iou, inter_px, union_px = out

    ref_iou, ref_inter, ref_union = _reference(target, inputs, 0.5)
    assert jnp.allclose(inter_px, ref_inter)
    assert jnp.allclose(union_px, ref_union)
    assert jnp.allclose(batch_iou, ref_iou, rtol=1e-6)

    # Stress test: odd spatial size exercises the masked partial tile, the
    # skipped clamped tile of the second split, and the split combine.
    k3, k4 = jax.random.split(k2)
    target2 = jax.random.uniform(k3, (2, 3, 17, 19), dtype=jnp.float32)
    inputs2 = jax.random.uniform(k4, (2, 3, 17, 19), dtype=jnp.float32)
    out2 = iou_forward(target2, inputs2, threshold=0.5, tile_n=384, num_splits=2)
    jax.block_until_ready(out2)
    b2, i2, u2 = out2
    r2_iou, r2_i, r2_u = _reference(target2, inputs2, 0.5)
    assert jnp.allclose(i2, r2_i)
    assert jnp.allclose(u2, r2_u)
    assert jnp.allclose(b2, r2_iou, rtol=1e-6)

    # Native-dtype (bfloat16) path: no wrapper cast, in-kernel compare, and
    # dtype-aware sublane packing (rows -> 16 for bf16).
    target_bf = target.astype(jnp.bfloat16)
    inputs_bf = inputs.astype(jnp.bfloat16)
    out3 = iou_forward(target_bf, inputs_bf, threshold=0.5)
    jax.block_until_ready(out3)
    b3, i3, u3 = out3
    r3_iou, r3_i, r3_u = _reference(target_bf, inputs_bf, 0.5)
    assert jnp.allclose(i3, r3_i)
    assert jnp.allclose(u3, r3_u)
    assert jnp.allclose(b3, r3_iou, rtol=1e-6)

    print("KERNEL_OK")
</pallas_src>

<mosaic_0001>
module attributes {stable_mosaic.version = 11 : i64} {
  func.func @_iou_sums_kernel(%arg0: i32, %arg1: i32, %arg2: memref<8x256xf32, #tpu.memory_space<vmem>>, %arg3: memref<8x256xf32, #tpu.memory_space<vmem>>, %arg4: memref<1x8x1xf32, #tpu.memory_space<vmem>>, %arg5: memref<1x8x1xf32, #tpu.memory_space<vmem>>) attributes {dimension_semantics = [#tpu.dimension_semantics<parallel>, #tpu.dimension_semantics<arbitrary>], iteration_bounds = array<i64: 1, 1>, scalar_prefetch = 0 : i64, scratch_operands = 0 : i64, tpu.core_type = #tpu.core_type<tc>, window_params = [{transform_indices = @transform_0, window_bounds = array<i64: 8, 256>}, {transform_indices = @transform_1, window_bounds = array<i64: 8, 256>}, {transform_indices = @transform_2, window_bounds = array<i64: 1, 8, 1>}, {transform_indices = @transform_3, window_bounds = array<i64: 1, 8, 1>}]} {
    %c0_i32 = arith.constant 0 : i32
    %0 = arith.cmpi eq, %arg1, %c0_i32 : i32
    %1 = arith.extui %0 : i1 to i32
    %c0_i32_0 = arith.constant 0 : i32
    %2 = arith.cmpi ne, %1, %c0_i32_0 : i32
    scf.if %2 {
      %cst = arith.constant 0.000000e+00 : f32
      %16 = vector.broadcast %cst : f32 to vector<8x1xf32>
      %c0 = arith.constant 0 : index
      %c0_8 = arith.constant 0 : index
      %c0_9 = arith.constant 0 : index
      %17 = vector.load %arg4[%c0, %c0_8, %c0_9] : memref<1x8x1xf32, #tpu.memory_space<vmem>>, vector<1x8x1xf32>
      %18 = vector.shape_cast %17 : vector<1x8x1xf32> to vector<8x1xf32>
      %19 = vector.shape_cast %16 : vector<8x1xf32> to vector<1x8x1xf32>
      tpu.vector_store %arg4[%c0, %c0_8, %c0_9], %19 {strides = array<i32>} : memref<1x8x1xf32, #tpu.memory_space<vmem>>, vector<1x8x1xf32>,
      %cst_10 = arith.constant 0.000000e+00 : f32
      %20 = vector.broadcast %cst_10 : f32 to vector<8x1xf32>
      %c0_11 = arith.constant 0 : index
      %c0_12 = arith.constant 0 : index
      %c0_13 = arith.constant 0 : index
      %21 = vector.load %arg5[%c0_11, %c0_12, %c0_13] : memref<1x8x1xf32, #tpu.memory_space<vmem>>, vector<1x8x1xf32>
      %22 = vector.shape_cast %21 : vector<1x8x1xf32> to vector<8x1xf32>
      %23 = vector.shape_cast %20 : vector<8x1xf32> to vector<1x8x1xf32>
      tpu.vector_store %arg5[%c0_11, %c0_12, %c0_13], %23 {strides = array<i32>} : memref<1x8x1xf32, #tpu.memory_space<vmem>>, vector<1x8x1xf32>,
    } else {
    }
    %c1_i32 = arith.constant 1 : i32
    %3 = arith.muli %arg0, %c1_i32 : i32
    %4 = arith.addi %3, %arg1 : i32
    %c256_i32 = arith.constant 256 : i32
    %5 = arith.muli %4, %c256_i32 : i32
    %c256_i32_1 = arith.constant 256 : i32
    %6 = arith.addi %5, %c256_i32_1 : i32
    %c256_i32_2 = arith.constant 256 : i32
    %7 = arith.cmpi sle, %6, %c256_i32_2 : i32
    %8 = arith.extui %7 : i1 to i32
    %c0_i32_3 = arith.constant 0 : i32
    %9 = arith.cmpi ne, %8, %c0_i32_3 : i32
    scf.if %9 {
      %c0 = arith.constant 0 : index
      %c0_8 = arith.constant 0 : index
      %16 = vector.load %arg2[%c0, %c0_8] : memref<8x256xf32, #tpu.memory_space<vmem>>, vector<8x256xf32>
      %cst = arith.constant 5.000000e-01 : f32
      %17 = vector.broadcast %cst : f32 to vector<8x256xf32>
      %18 = arith.cmpf ogt, %16, %17 : vector<8x256xf32>
      %c0_9 = arith.constant 0 : index
      %c0_10 = arith.constant 0 : index
      %19 = vector.load %arg3[%c0_9, %c0_10] : memref<8x256xf32, #tpu.memory_space<vmem>>, vector<8x256xf32>
      %cst_11 = arith.constant 5.000000e-01 : f32
      %20 = vector.broadcast %cst_11 : f32 to vector<8x256xf32>
      %21 = arith.cmpf ogt, %19, %20 : vector<8x256xf32>
      %22 = arith.andi %18, %21 : vector<8x256xi1>
      %23 = arith.ori %18, %21 : vector<8x256xi1>
      %c0_12 = arith.constant 0 : index
      %c0_13 = arith.constant 0 : index
      %c0_14 = arith.constant 0 : index
      %24 = vector.load %arg4[%c0_12, %c0_13, %c0_14] : memref<1x8x1xf32, #tpu.memory_space<vmem>>, vector<1x8x1xf32>
      %25 = vector.shape_cast %24 : vector<1x8x1xf32> to vector<8x1xf32>
      %26 = arith.extui %22 : vector<8x256xi1> to vector<8x256xi32>
      %27 = arith.sitofp %26 : vector<8x256xi32> to vector<8x256xf32>
      %cst_15 = arith.constant dense<0.000000e+00> : vector<8xf32>
      %28 = vector.multi_reduction <add>, %27, %cst_15 [1] : vector<8x256xf32> to vector<8xf32>
      %29 = vector.shape_cast %28 : vector<8xf32> to vector<8x1xf32>
      %30 = arith.addf %25, %29 : vector<8x1xf32>
      %c0_16 = arith.constant 0 : index
      %c0_17 = arith.constant 0 : index
      %c0_18 = arith.constant 0 : index
      %31 = vector.load %arg4[%c0_16, %c0_17, %c0_18] : memref<1x8x1xf32, #tpu.memory_space<vmem>>, vector<1x8x1xf32>
      %32 = vector.shape_cast %31 : vector<1x8x1xf32> to vector<8x1xf32>
      %33 = vector.shape_cast %30 : vector<8x1xf32> to vector<1x8x1xf32>
      tpu.vector_store %arg4[%c0_16, %c0_17, %c0_18], %33 {strides = array<i32>} : memref<1x8x1xf32, #tpu.memory_space<vmem>>, vector<1x8x1xf32>,
      %c0_19 = arith.constant 0 : index
      %c0_20 = arith.constant 0 : index
      %c0_21 = arith.constant 0 : index
      %34 = vector.load %arg5[%c0_19, %c0_20, %c0_21] : memref<1x8x1xf32, #tpu.memory_space<vmem>>, vector<1x8x1xf32>
      %35 = vector.shape_cast %34 : vector<1x8x1xf32> to vector<8x1xf32>
      %36 = arith.extui %23 : vector<8x256xi1> to vector<8x256xi32>
      %37 = arith.sitofp %36 : vector<8x256xi32> to vector<8x256xf32>
      %cst_22 = arith.constant dense<0.000000e+00> : vector<8xf32>
      %38 = vector.multi_reduction <add>, %37, %cst_22 [1] : vector<8x256xf32> to vector<8xf32>
      %39 = vector.shape_cast %38 : vector<8xf32> to vector<8x1xf32>
      %40 = arith.addf %35, %39 : vector<8x1xf32>
      %c0_23 = arith.constant 0 : index
      %c0_24 = arith.constant 0 : index
      %c0_25 = arith.constant 0 : index
      %41 = vector.load %arg5[%c0_23, %c0_24, %c0_25] : memref<1x8x1xf32, #tpu.memory_space<vmem>>, vector<1x8x1xf32>
      %42 = vector.shape_cast %41 : vector<1x8x1xf32> to vector<8x1xf32>
      %43 = vector.shape_cast %40 : vector<8x1xf32> to vector<1x8x1xf32>
      tpu.vector_store %arg5[%c0_23, %c0_24, %c0_25], %43 {strides = array<i32>} : memref<1x8x1xf32, #tpu.memory_space<vmem>>, vector<1x8x1xf32>,
    } else {
    }
    %c256_i32_4 = arith.constant 256 : i32
    %10 = arith.cmpi slt, %5, %c256_i32_4 : i32
    %c256_i32_5 = arith.constant 256 : i32
    %11 = arith.addi %5, %c256_i32_5 : i32
    %c256_i32_6 = arith.constant 256 : i32
    %12 = arith.cmpi sgt, %11, %c256_i32_6 : i32
    %13 = arith.andi %10, %12 : i1
    %14 = arith.extui %13 : i1 to i32
    %c0_i32_7 = arith.constant 0 : i32
    %15 = arith.cmpi ne, %14, %c0_i32_7 : i32
    scf.if %15 {
      %16 = tpu.iota {dimensions = array<i32: 1>} : vector<8x256xi32>
      %17 = vector.broadcast %5 : i32 to vector<8x256xi32>
      %18 = arith.addi %17, %16 : vector<8x256xi32>
      %c256_i32_8 = arith.constant 256 : i32
      %19 = vector.broadcast %c256_i32_8 : i32 to vector<8x256xi32>
      %20 = arith.cmpi slt, %18, %19 : vector<8x256xi32>
      %c0 = arith.constant 0 : index
      %c0_9 = arith.constant 0 : index
      %21 = vector.load %arg2[%c0, %c0_9] : memref<8x256xf32, #tpu.memory_space<vmem>>, vector<8x256xf32>
      %cst = arith.constant 5.000000e-01 : f32
      %22 = vector.broadcast %cst : f32 to vector<8x256xf32>
      %23 = arith.cmpf ogt, %21, %22 : vector<8x256xf32>
      %c0_10 = arith.constant 0 : index
      %c0_11 = arith.constant 0 : index
      %24 = vector.load %arg3[%c0_10, %c0_11] : memref<8x256xf32, #tpu.memory_space<vmem>>, vector<8x256xf32>
      %cst_12 = arith.constant 5.000000e-01 : f32
      %25 = vector.broadcast %cst_12 : f32 to vector<8x256xf32>
      %26 = arith.cmpf ogt, %24, %25 : vector<8x256xf32>
      %27 = arith.andi %23, %26 : vector<8x256xi1>
      %28 = arith.ori %23, %26 : vector<8x256xi1>
      %29 = arith.andi %27, %20 : vector<8x256xi1>
      %30 = arith.andi %28, %20 : vector<8x256xi1>
      %c0_13 = arith.constant 0 : index
      %c0_14 = arith.constant 0 : index
      %c0_15 = arith.constant 0 : index
      %31 = vector.load %arg4[%c0_13, %c0_14, %c0_15] : memref<1x8x1xf32, #tpu.memory_space<vmem>>, vector<1x8x1xf32>
      %32 = vector.shape_cast %31 : vector<1x8x1xf32> to vector<8x1xf32>
      %33 = arith.extui %29 : vector<8x256xi1> to vector<8x256xi32>
      %34 = arith.sitofp %33 : vector<8x256xi32> to vector<8x256xf32>
      %cst_16 = arith.constant dense<0.000000e+00> : vector<8xf32>
      %35 = vector.multi_reduction <add>, %34, %cst_16 [1] : vector<8x256xf32> to vector<8xf32>
      %36 = vector.shape_cast %35 : vector<8xf32> to vector<8x1xf32>
      %37 = arith.addf %32, %36 : vector<8x1xf32>
      %c0_17 = arith.constant 0 : index
      %c0_18 = arith.constant 0 : index
      %c0_19 = arith.constant 0 : index
      %38 = vector.load %arg4[%c0_17, %c0_18, %c0_19] : memref<1x8x1xf32, #tpu.memory_space<vmem>>, vector<1x8x1xf32>
      %39 = vector.shape_cast %38 : vector<1x8x1xf32> to vector<8x1xf32>
      %40 = vector.shape_cast %37 : vector<8x1xf32> to vector<1x8x1xf32>
      tpu.vector_store %arg4[%c0_17, %c0_18, %c0_19], %40 {strides = array<i32>} : memref<1x8x1xf32, #tpu.memory_space<vmem>>, vector<1x8x1xf32>,
      %c0_20 = arith.constant 0 : index
      %c0_21 = arith.constant 0 : index
      %c0_22 = arith.constant 0 : index
      %41 = vector.load %arg5[%c0_20, %c0_21, %c0_22] : memref<1x8x1xf32, #tpu.memory_space<vmem>>, vector<1x8x1xf32>
      %42 = vector.shape_cast %41 : vector<1x8x1xf32> to vector<8x1xf32>
      %43 = arith.extui %30 : vector<8x256xi1> to vector<8x256xi32>
      %44 = arith.sitofp %43 : vector<8x256xi32> to vector<8x256xf32>
      %cst_23 = arith.constant dense<0.000000e+00> : vector<8xf32>
      %45 = vector.multi_reduction <add>, %44, %cst_23 [1] : vector<8x256xf32> to vector<8xf32>
      %46 = vector.shape_cast %45 : vector<8xf32> to vector<8x1xf32>
      %47 = arith.addf %42, %46 : vector<8x1xf32>
      %c0_24 = arith.constant 0 : index
      %c0_25 = arith.constant 0 : index
      %c0_26 = arith.constant 0 : index
      %48 = vector.load %arg5[%c0_24, %c0_25, %c0_26] : memref<1x8x1xf32, #tpu.memory_space<vmem>>, vector<1x8x1xf32>
      %49 = vector.shape_cast %48 : vector<1x8x1xf32> to vector<8x1xf32>
      %50 = vector.shape_cast %47 : vector<8x1xf32> to vector<1x8x1xf32>
      tpu.vector_store %arg5[%c0_24, %c0_25, %c0_26], %50 {strides = array<i32>} : memref<1x8x1xf32, #tpu.memory_space<vmem>>, vector<1x8x1xf32>,
    } else {
    }
    return
  }
  func.func @transform_0(%arg0: i32, %arg1: i32) -> (i32, i32) {
    %c1_i32 = arith.constant 1 : i32
    %0 = arith.muli %arg0, %c1_i32 : i32
    %1 = arith.addi %0, %arg1 : i32
    %c0_i32 = arith.constant 0 : i32
    %2 = arith.minsi %1, %c0_i32 : i32
    %c0_i32_0 = arith.constant 0 : i32
    %c0_i32_1 = arith.constant 0 : i32
    return %c0_i32_0, %2 : i32, i32
  }
  func.func @transform_1(%arg0: i32, %arg1: i32) -> (i32, i32) {
    %c1_i32 = arith.constant 1 : i32
    %0 = arith.muli %arg0, %c1_i32 : i32
    %1 = arith.addi %0, %arg1 : i32
    %c0_i32 = arith.constant 0 : i32
    %2 = arith.minsi %1, %c0_i32 : i32
    %c0_i32_0 = arith.constant 0 : i32
    %c0_i32_1 = arith.constant 0 : i32
    return %c0_i32_0, %2 : i32, i32
  }
  func.func @transform_2(%arg0: i32, %arg1: i32) -> (i32, i32, i32) {
    %c0_i32 = arith.constant 0 : i32
    %c0_i32_0 = arith.constant 0 : i32
    %c0_i32_1 = arith.constant 0 : i32
    return %arg0, %c0_i32, %c0_i32_0 : i32, i32, i32
  }
  func.func @transform_3(%arg0: i32, %arg1: i32) -> (i32, i32, i32) {
    %c0_i32 = arith.constant 0 : i32
    %c0_i32_0 = arith.constant 0 : i32
    %c0_i32_1 = arith.constant 0 : i32
    return %arg0, %c0_i32, %c0_i32_0 : i32, i32, i32
  }
}

</mosaic_0001>

<bundles_post_ra>
// kernel: tpu_custom_call.1
= control target key start
LH: loop header
LB: loop body
LE: loop exit
PB: predicated region body
PF: predicated region fallthrough
CT: control target
= control target key end

     0   :  { %9 = vsyncpa [#allocation3], 0  ;;  %s297_s0 = inlined_call_operand.hbm [shape: f32[8,256], index: 0, kind: input, shape index: {}]   ;;  %s298_s1 = inlined_call_operand.hbm [shape: f32[8,256], index: 1, kind: input, shape index: {}]   ;;  %s299_s2 = inlined_call_operand.vmem [shape: f32[1,8,1], index: 2, kind: output, shape index: {0}]   ;;  %s300_s3 = inlined_call_operand.vmem [shape: f32[1,8,1], index: 3, kind: output, shape index: {1}]  }
   0x1   :  { %10 = vsyncpa [#allocation5], 0  ;;  %s228_s12 = smov [#allocation2]   ;;  %s229_s14 = smov [#allocation4]  }
   0x2   :  { %s23_s13 = sshll.u32 %s228_s12, 4  ;;  %s39_s15 = sshll.u32 %s229_s14, 4  ;;  %s24_s13 = int_to_ptr.vmem [resolvable:$true] %s23_s13  ;;  %s40_s15 = int_to_ptr.vmem [resolvable:$true] %s39_s15 }
   0x3   :  { %s180_s18 = scalar_lea.hbm %s297_s0, 256 }
   0x4   :  { %p181_p0 = scmp.ne.s32.totalorder %s297_s0, %s180_s18  ;;  %p184_p1 = scmp.lt.u32.totalorder %s180_s18, %s297_s0 }
   0x6   :  { %p186_p2 = pnand %p184_p1, %p181_p0 }
   0x8   :  { %189 = shalt.err (!%p186_p2)
}
   0x9   :  { %s190_s23 = scalar_lea.vmem %s24_s13, 256  ;;  %p195_p4 = scmp.lt.s32.totalorder %s24_s13, %s24_s13 }
   0xa   :  { %p191_p3 = scmp.ne.s32.totalorder %s24_s13, %s190_s23  ;;  %p196_p5 = scmp.lt.s32.totalorder %s190_s23, %s190_s23 }
   0xc   :  { %p197_p6 = por %p196_p5, %p195_p4 }
   0xe   :  { %p198_p7 = pnand %p197_p6, %p191_p3 }
  0x10   :  { %201 = shalt.err (!%p198_p7)
}
  0x11   :  { %26 = dma.hbm_to_vmem [thread:$0]  %s297_s0, 256, %s24_s13, [#allocation3]  }
  0x12   :  { %s202_s28 = scalar_lea.hbm %s298_s1, 256 }
  0x13   :  { %p203_p8 = scmp.ne.s32.totalorder %s298_s1, %s202_s28  ;;  %p206_p9 = scmp.lt.u32.totalorder %s202_s28, %s298_s1 }
  0x15   :  { %p208_p10 = pnand %p206_p9, %p203_p8 }
  0x17   :  { %211 = shalt.err (!%p208_p10)
}
  0x18   :  { %s212_s6 = scalar_lea.vmem %s40_s15, 256  ;;  %p217_p12 = scmp.lt.s32.totalorder %s40_s15, %s40_s15 }
  0x19   :  { %p213_p11 = scmp.ne.s32.totalorder %s40_s15, %s212_s6  ;;  %p218_p13 = scmp.lt.s32.totalorder %s212_s6, %s212_s6 }
  0x1b   :  { %p219_p0 = por %p218_p13, %p217_p12 }
  0x1d   :  { %p220_p1 = pnand %p219_p0, %p213_p11 }
  0x1f   :  { %223 = shalt.err (!%p220_p1)
}
  0x20   :  { %42 = dma.hbm_to_vmem [thread:$0]  %s298_s1, 256, %s40_s15, [#allocation5]  }
  0x21   :  { %224 = dma.done.wait [#allocation3], 256  }
  0x22   :  { %225 = vsyncadd [#allocation3], 4294967040 }
  0x23   :  { %226 = dma.done.wait [#allocation5], 256  }
  0x24   :  { %227 = vsyncadd [#allocation5], 4294967040  ;;  %vm61_vm0 = vcmask 7168   ;;  %v230_v0 = vmov 0.0   ;;  %v71_v1 = vld [vmem:[#allocation2] sm:$0xff]  ;;  %v72_v2 = vld [vmem:[#allocation2 + $0x8] sm:$0xff] }
  0x25   :  { %62 = vst.msk [vmem:[%s299_s2] sm:$0xff] %vm61_vm0, %v230_v0  ;;  %63 = vst.msk [vmem:[%s300_s3] sm:$0xff] %vm61_vm0, %v230_v0  ;;  %v75_v3 = vld [vmem:[#allocation4] sm:$0xff]  ;;  %vm73_vm1 = vcmp.gt.f32.partialorder %v71_v1, 0.5  ;;  %vm74_vm2 = vcmp.gt.f32.partialorder %v72_v2, 0.5  ;;  %v76_v4 = vld [vmem:[#allocation4 + $0x8] sm:$0xff] }
  0x26   :  { %vm77_vm3 = vcmp.gt.f32.partialorder %v75_v3, 0.5  ;;  %vm78_vm4 = vcmp.gt.f32.partialorder %v76_v4, 0.5 }
  0x27   :  { %vm79_vm5 = vmand %vm73_vm1, %vm77_vm3 }
  0x28   :  { %vm80_vm6 = vmand %vm74_vm2, %vm78_vm4  ;;  %v169_v5 = vsel %vm79_vm5, 1.0, %v230_v0 }
  0x29   :  { %v170_v6 = vsel %vm80_vm6, 1.0, %v230_v0  ;;  %vm81_vm7 = vmor %vm73_vm1, %vm77_vm3 }
  0x2a   :  { %v88_v7 = vadd.f32 %v170_v6, %v169_v5  ;;  %vm82_vm8 = vmor %vm74_vm2, %vm78_vm4  ;;  %v171_v8 = vsel %vm81_vm7, 1.0, %v230_v0 }
  0x2b   :  { %v172_v9 = vsel %vm82_vm8, 1.0, %v230_v0 }
  0x2c   :  { %89 = vadd.xlane.f32.xlu0 %v88_v7  ;;  %v99_v10 = vadd.f32 %v172_v9, %v171_v8  ;;  %v83_v11 = vld [vmem:[%s299_s2] sm:$0xff] }
  0x2d   :  { %v94_v14 = vld [vmem:[%s300_s3] sm:$0xff] }
  0x30   :  { %100 = vadd.xlane.f32.xlu0 %v99_v10 }
  0xb9   :  { %v90_v12 = vpop.xlane.xlu0 %89 }
  0xba   :  { %v91_v13 = vadd.f32 %v90_v12, %v83_v11 }
  0xbc   :  { %93 = vst.msk [vmem:[%s299_s2] sm:$0xff] %vm61_vm0, %v91_v13 }
  0xbd   :  { %v101_v15 = vpop.xlane.xlu0 %100 }
  0xbe   :  { %v102_v16 = vadd.f32 %v101_v15, %v94_v14 }
  0xc0   :  { %103 = vst.msk [vmem:[%s300_s3] sm:$0xff] %vm61_vm0, %v102_v16 }
  0xc1   :  { %163 = vsyncpa [#allocation3], 1 }
  0xc2   :  { %164 = vsyncpa [#allocation5], 1 }

</bundles_post_ra>
